<compile_context>
chip_gen: v6e
topology: v6e:2x2x1
jax: 0.10.0
libtpu: 0.0.40
codegen_flags: <defaults>
</compile_context>

<pallas_src>
import functools

import jax
import jax.numpy as jnp
from jax.experimental import pallas as pl
from jax.experimental.pallas import tpu as pltpu


def _mha_kernel(q_ref, k_ref, v_ref, wq_ref, wk_ref, wv_ref, wfc_ref,
                gamma_ref, beta_ref, o_ref, *, n_head, d_k, d_v,
                inv_temperature, eps, mxu_dtype):
    b_blk, t_q, d_model = q_ref.shape
    t_k = k_ref.shape[1]
    m_q = b_blk * t_q
    m_k = b_blk * t_k

    # Load the activation block once; keep the UNscaled q for the residual.
    q2d = q_ref[...].reshape(m_q, d_model)              # (Mq, D) f32 residual
    k2d = k_ref[...].reshape(m_k, d_model)               # (Mk, D)
    v2d = v_ref[...].reshape(m_k, d_model)               # (Mk, D)

    def mx(x):  # MXU operand dtype (f32 by default; bf16 on v6e/v7x prod runs)
        return x.astype(mxu_dtype)

    # Merged projections: one dense dot per projection using the original
    # un-split weights.  Temperature folded once into q: (q*c)@Wq == c*(q@Wq).
    qp = jnp.dot(mx(q2d * inv_temperature), wq_ref[...],
                 preferred_element_type=jnp.float32)      # (Mq, H*dk)
    kp = jnp.dot(mx(k2d), wk_ref[...],
                 preferred_element_type=jnp.float32)      # (Mk, H*dk)
    vp = jnp.dot(mx(v2d), wv_ref[...],
                 preferred_element_type=jnp.float32)      # (Mk, H*dv)

    qp = qp.reshape(b_blk, t_q, n_head * d_k)
    kp = kp.reshape(b_blk, t_k, n_head * d_k)
    vp = vp.reshape(b_blk, t_k, n_head * d_v)

    # Fold heads into the leading (batch) axis: major-dim concat only, so the
    # attention itself is a single batched dot_general over (head, batch).
    qh = jnp.concatenate([qp[:, :, h * d_k:(h + 1) * d_k] for h in range(n_head)], axis=0)
    kh = jnp.concatenate([kp[:, :, h * d_k:(h + 1) * d_k] for h in range(n_head)], axis=0)
    vh = jnp.concatenate([vp[:, :, h * d_v:(h + 1) * d_v] for h in range(n_head)], axis=0)

    # QK^T contracting d_k of both operands directly (no .T / XLU transpose).
    s = jnp.einsum('bqd,bkd->bqk', mx(qh), mx(kh),
                   preferred_element_type=jnp.float32)    # (H*b, Tq, Tk)

    # Numerically-stable softmax in f32 with an EXACT divide (the approx
    # reciprocal caused the previous correctness failure; the divide is on a
    # tiny tensor, so correctness wins over the EUP-slot trick).
    s_max = jnp.max(s, axis=-1, keepdims=True)
    p = jnp.exp(s - s_max)
    p = p / jnp.sum(p, axis=-1, keepdims=True)
    # dropout1: identity in eval mode.

    o = jnp.einsum('bqk,bkd->bqd', mx(p), mx(vh),
                   preferred_element_type=jnp.float32)    # (H*b, Tq, dv)

    # Output projection: concat_h(o_h) @ W_fc == sum_h o_h @ W_fc[h], expressed
    # as one head-batched dot_general + a sum over the (major) head axis.
    o_heads = o.reshape(n_head, m_q, d_v)                 # leading-dim reshape only
    proj = jnp.einsum('hmd,hdn->hmn', mx(o_heads), wfc_ref[...],
                      preferred_element_type=jnp.float32)  # (H, Mq, D)
    out = jnp.sum(proj, axis=0)                           # (Mq, D)
    # dropout2: identity in eval mode.  Residual uses the unscaled q.
    out = out + q2d

    # LayerNorm over the model dim, eps=1e-6, f32 statistics.
    mean = jnp.mean(out, axis=-1, keepdims=True)
    cen = out - mean
    var = jnp.mean(cen * cen, axis=-1, keepdims=True)
    y = cen * jax.lax.rsqrt(var + eps)
    y = y * gamma_ref[...] + beta_ref[...]

    o_ref[...] = y.reshape(b_blk, t_q, d_model).astype(o_ref.dtype)


def multi_head_attention(q, k, v, wq, wk, wv, wfc, gamma, beta, *,
                         n_head, d_k, d_v, batch_block=None,
                         mxu_dtype=jnp.float32):
    B, Tq, D = q.shape
    _, Tk, _ = k.shape

    if batch_block is None:
        # Default to >=2 grid steps so both v7x TensorCores get work with
        # dimension_semantics=("parallel",): largest divisor of B <= B//2.
        batch_block = 1
        for cand in range(max(1, B // 2), 0, -1):
            if B % cand == 0:
                batch_block = cand
                break
    assert B % batch_block == 0
    n_blocks = B // batch_block
    inv_temperature = 1.0 / (float(d_k) ** 0.5)

    # Head-major output-projection weight (wrapper-side relayout, zero kernel
    # cost): wfc_hm[h] == wfc[h*d_v:(h+1)*d_v, :].
    wfc_hm = wfc.reshape(n_head, d_v, D)

    # Cast only the MXU weight operands; gamma/beta and all statistics stay f32.
    wq_c = wq.astype(mxu_dtype)
    wk_c = wk.astype(mxu_dtype)
    wv_c = wv.astype(mxu_dtype)
    wfc_c = wfc_hm.astype(mxu_dtype)

    kernel = functools.partial(
        _mha_kernel, n_head=n_head, d_k=d_k, d_v=d_v,
        inv_temperature=inv_temperature, eps=1e-6, mxu_dtype=mxu_dtype)

    # VMEM budget derived from the actual footprint (double-buffered blocks +
    # resident weights + generous headroom for temporaries), capped well below
    # v7x's 64 MiB per-TC VMEM.
    itemsize = 4
    blk_act = batch_block * (2 * Tq * D + 2 * Tk * D)        # q + out + k + v blocks
    weights = wq.size + wk.size + wv.size + wfc.size + gamma.size + beta.size
    vmem_limit = int(min(48 * 2**20, max(16 * 2**20, 8 * itemsize * (blk_act + weights))))

    # Advisory cost estimate for XLA's scheduler.
    flops = int(2 * B * Tq * D * n_head * d_k            # Q projection
                + 2 * B * Tk * D * n_head * d_k           # K projection
                + 2 * B * Tk * D * n_head * d_v           # V projection
                + 2 * B * n_head * Tq * Tk * (d_k + d_v)  # QK^T + PV
                + 2 * B * Tq * n_head * d_v * D)          # output projection
    transcendentals = int(B * n_head * Tq * Tk + B * Tq)  # exp + rsqrt
    bytes_accessed = int(itemsize * (q.size + k.size + v.size + B * Tq * D)
                         + itemsize * weights)

    return pl.pallas_call(
        kernel,
        out_shape=jax.ShapeDtypeStruct((B, Tq, D), jnp.float32),
        grid_spec=pltpu.PrefetchScalarGridSpec(
            num_scalar_prefetch=0,
            grid=(n_blocks,),
            in_specs=[
                pl.BlockSpec((batch_block, Tq, D), lambda b: (b, 0, 0)),   # q
                pl.BlockSpec((batch_block, Tk, D), lambda b: (b, 0, 0)),   # k
                pl.BlockSpec((batch_block, Tk, D), lambda b: (b, 0, 0)),   # v
                # Weights: constant index_map -> fetched once, kept resident
                # across grid steps (no per-step re-DMA).
                pl.BlockSpec(wq_c.shape, lambda b: (0, 0)),                # w_qs (D, H*dk)
                pl.BlockSpec(wk_c.shape, lambda b: (0, 0)),                # w_ks (D, H*dk)
                pl.BlockSpec(wv_c.shape, lambda b: (0, 0)),                # w_vs (D, H*dv)
                pl.BlockSpec(wfc_c.shape, lambda b: (0, 0, 0)),            # fc   (H, dv, D)
                pl.BlockSpec((1, D), lambda b: (0, 0)),                    # ln gamma
                pl.BlockSpec((1, D), lambda b: (0, 0)),                    # ln beta
            ],
            out_specs=pl.BlockSpec((batch_block, Tq, D), lambda b: (b, 0, 0)),
        ),
        compiler_params=pltpu.CompilerParams(
            dimension_semantics=("parallel",),
            vmem_limit_bytes=vmem_limit),
        cost_estimate=pl.CostEstimate(
            flops=flops, transcendentals=transcendentals,
            bytes_accessed=bytes_accessed),
    )(q, k, v, wq_c, wk_c, wv_c, wfc_c, gamma, beta)


def _reference(q, k, v, wq, wk, wv, wfc, gamma, beta, *, n_head, d_k, d_v):
    """Pure-JAX reference mirroring the PyTorch forward (eval mode), full f32."""
    B, Tq, D = q.shape
    Tk = k.shape[1]
    temperature = float(d_k) ** 0.5
    hp = jax.lax.Precision.HIGHEST
    residual = q
    qh = jnp.dot(q, wq, precision=hp).reshape(B, Tq, n_head, d_k).transpose(0, 2, 1, 3)
    kh = jnp.dot(k, wk, precision=hp).reshape(B, Tk, n_head, d_k).transpose(0, 2, 1, 3)
    vh = jnp.dot(v, wv, precision=hp).reshape(B, Tk, n_head, d_v).transpose(0, 2, 1, 3)
    attn = jnp.einsum('bhqd,bhkd->bhqk', qh / temperature, kh, precision=hp)
    attn = jax.nn.softmax(attn, axis=-1)
    o = jnp.einsum('bhqk,bhkd->bhqd', attn, vh, precision=hp)
    o = o.transpose(0, 2, 1, 3).reshape(B, Tq, n_head * d_v)
    o = jnp.dot(o, wfc, precision=hp) + residual
    mean = jnp.mean(o, axis=-1, keepdims=True)
    var = jnp.mean((o - mean) ** 2, axis=-1, keepdims=True)
    return (o - mean) / jnp.sqrt(var + 1e-6) * gamma[0] + beta[0]


if __name__ == "__main__":
    # Small 'enc'-block configuration.
    batch = 2
    q_steps = 8
    k_steps = 8
    n_head = 2
    d_k = 8
    d_v = 8
    d_model_sp = 16
    d_model_traj = 16
    d_model = d_model_sp + d_model_traj   # 32

    key = jax.random.PRNGKey(0)
    ks = jax.random.split(key, 7)

    q = jax.random.normal(ks[0], (batch, q_steps, d_model), jnp.float32)
    k = jax.random.normal(ks[1], (batch, k_steps, d_model), jnp.float32)
    v = jax.random.normal(ks[2], (batch, k_steps, d_model), jnp.float32)

    # Deterministic parameter init (nn.Linear weights, stored as (in, out)).
    scale = 1.0 / (d_model ** 0.5)
    wq = jax.random.normal(ks[3], (d_model, n_head * d_k), jnp.float32) * scale
    wk = jax.random.normal(ks[4], (d_model, n_head * d_k), jnp.float32) * scale
    wv = jax.random.normal(ks[5], (d_model, n_head * d_v), jnp.float32) * scale
    wfc = jax.random.normal(ks[6], (n_head * d_v, d_model), jnp.float32) * scale
    gamma = jnp.ones((1, d_model), jnp.float32)   # nn.LayerNorm default weight
    beta = jnp.zeros((1, d_model), jnp.float32)   # nn.LayerNorm default bias

    out = multi_head_attention(q, k, v, wq, wk, wv, wfc, gamma, beta,
                               n_head=n_head, d_k=d_k, d_v=d_v)
    out = jax.block_until_ready(out)

    ref = _reference(q, k, v, wq, wk, wv, wfc, gamma, beta,
                     n_head=n_head, d_k=d_k, d_v=d_v)
    assert out.shape == (batch, q_steps, d_model)
    # Exact softmax divide + HIGHEST-precision reference: tolerance only needs
    # to absorb MXU f32 pass / reassociation differences.
    assert jnp.allclose(out, ref, atol=5e-3, rtol=5e-3), (
        float(jnp.max(jnp.abs(out - ref))))

    print("KERNEL_OK")
</pallas_src>

<mosaic_0001>
module attributes {stable_mosaic.version = 11 : i64} {
  func.func @_mha_kernel(%arg0: i32, %arg1: memref<1x8x32xf32, #tpu.memory_space<vmem>>, %arg2: memref<1x8x32xf32, #tpu.memory_space<vmem>>, %arg3: memref<1x8x32xf32, #tpu.memory_space<vmem>>, %arg4: memref<32x16xf32, #tpu.memory_space<vmem>>, %arg5: memref<32x16xf32, #tpu.memory_space<vmem>>, %arg6: memref<32x16xf32, #tpu.memory_space<vmem>>, %arg7: memref<2x8x32xf32, #tpu.memory_space<vmem>>, %arg8: memref<1x32xf32, #tpu.memory_space<vmem>>, %arg9: memref<1x32xf32, #tpu.memory_space<vmem>>, %arg10: memref<1x8x32xf32, #tpu.memory_space<vmem>>) attributes {dimension_semantics = [#tpu.dimension_semantics<parallel>], iteration_bounds = array<i64: 2>, scalar_prefetch = 0 : i64, scratch_operands = 0 : i64, tpu.core_type = #tpu.core_type<tc>, window_params = [{transform_indices = @transform_0, window_bounds = array<i64: 1, 8, 32>}, {transform_indices = @transform_1, window_bounds = array<i64: 1, 8, 32>}, {transform_indices = @transform_2, window_bounds = array<i64: 1, 8, 32>}, {pipeline_mode = #tpu.pipeline_mode<synchronous>, transform_indices = @transform_3, window_bounds = array<i64: 32, 16>}, {pipeline_mode = #tpu.pipeline_mode<synchronous>, transform_indices = @transform_4, window_bounds = array<i64: 32, 16>}, {pipeline_mode = #tpu.pipeline_mode<synchronous>, transform_indices = @transform_5, window_bounds = array<i64: 32, 16>}, {pipeline_mode = #tpu.pipeline_mode<synchronous>, transform_indices = @transform_6, window_bounds = array<i64: 2, 8, 32>}, {pipeline_mode = #tpu.pipeline_mode<synchronous>, transform_indices = @transform_7, window_bounds = array<i64: 1, 32>}, {pipeline_mode = #tpu.pipeline_mode<synchronous>, transform_indices = @transform_8, window_bounds = array<i64: 1, 32>}, {transform_indices = @transform_9, window_bounds = array<i64: 1, 8, 32>}]} {
    %c0 = arith.constant 0 : index
    %c0_0 = arith.constant 0 : index
    %c0_1 = arith.constant 0 : index
    %0 = vector.load %arg1[%c0, %c0_0, %c0_1] : memref<1x8x32xf32, #tpu.memory_space<vmem>>, vector<1x8x32xf32>
    %1 = vector.shape_cast %0 : vector<1x8x32xf32> to vector<8x32xf32>
    %c0_2 = arith.constant 0 : index
    %c0_3 = arith.constant 0 : index
    %c0_4 = arith.constant 0 : index
    %2 = vector.load %arg2[%c0_2, %c0_3, %c0_4] : memref<1x8x32xf32, #tpu.memory_space<vmem>>, vector<1x8x32xf32>
    %3 = vector.shape_cast %2 : vector<1x8x32xf32> to vector<8x32xf32>
    %c0_5 = arith.constant 0 : index
    %c0_6 = arith.constant 0 : index
    %c0_7 = arith.constant 0 : index
    %4 = vector.load %arg3[%c0_5, %c0_6, %c0_7] : memref<1x8x32xf32, #tpu.memory_space<vmem>>, vector<1x8x32xf32>
    %5 = vector.shape_cast %4 : vector<1x8x32xf32> to vector<8x32xf32>
    %cst = arith.constant 0.353553385 : f32
    %6 = vector.broadcast %cst : f32 to vector<8x32xf32>
    %7 = arith.mulf %1, %6 : vector<8x32xf32>
    %c0_8 = arith.constant 0 : index
    %c0_9 = arith.constant 0 : index
    %8 = vector.load %arg4[%c0_8, %c0_9] : memref<32x16xf32, #tpu.memory_space<vmem>>, vector<32x16xf32>
    %cst_10 = arith.constant dense<0.000000e+00> : vector<8x16xf32>
    %9 = tpu.matmul %7, %8, %cst_10 {dimension_numbers = #tpu.dot_dimension_numbers<[1], [0], [0], [1], [0, 0, 1, 1], [], []>} : vector<8x32xf32>, vector<32x16xf32>, vector<8x16xf32> -> vector<8x16xf32>
    %c0_11 = arith.constant 0 : index
    %c0_12 = arith.constant 0 : index
    %10 = vector.load %arg5[%c0_11, %c0_12] : memref<32x16xf32, #tpu.memory_space<vmem>>, vector<32x16xf32>
    %cst_13 = arith.constant dense<0.000000e+00> : vector<8x16xf32>
    %11 = tpu.matmul %3, %10, %cst_13 {dimension_numbers = #tpu.dot_dimension_numbers<[1], [0], [0], [1], [0, 0, 1, 1], [], []>} : vector<8x32xf32>, vector<32x16xf32>, vector<8x16xf32> -> vector<8x16xf32>
    %c0_14 = arith.constant 0 : index
    %c0_15 = arith.constant 0 : index
    %12 = vector.load %arg6[%c0_14, %c0_15] : memref<32x16xf32, #tpu.memory_space<vmem>>, vector<32x16xf32>
    %cst_16 = arith.constant dense<0.000000e+00> : vector<8x16xf32>
    %13 = tpu.matmul %5, %12, %cst_16 {dimension_numbers = #tpu.dot_dimension_numbers<[1], [0], [0], [1], [0, 0, 1, 1], [], []>} : vector<8x32xf32>, vector<32x16xf32>, vector<8x16xf32> -> vector<8x16xf32>
    %14 = vector.shape_cast %9 : vector<8x16xf32> to vector<1x8x16xf32>
    %15 = vector.shape_cast %11 : vector<8x16xf32> to vector<1x8x16xf32>
    %16 = vector.shape_cast %13 : vector<8x16xf32> to vector<1x8x16xf32>
    %17 = vector.extract_strided_slice %14 {offsets = [0, 0, 0], sizes = [1, 8, 8], strides = [1, 1, 1]} : vector<1x8x16xf32> to vector<1x8x8xf32>
    %18 = vector.extract_strided_slice %14 {offsets = [0, 0, 8], sizes = [1, 8, 8], strides = [1, 1, 1]} : vector<1x8x16xf32> to vector<1x8x8xf32>
    %19 = tpu.concatenate %17, %18 in 0 : vector<1x8x8xf32>, vector<1x8x8xf32> -> vector<2x8x8xf32>
    %20 = vector.extract_strided_slice %15 {offsets = [0, 0, 0], sizes = [1, 8, 8], strides = [1, 1, 1]} : vector<1x8x16xf32> to vector<1x8x8xf32>
    %21 = vector.extract_strided_slice %15 {offsets = [0, 0, 8], sizes = [1, 8, 8], strides = [1, 1, 1]} : vector<1x8x16xf32> to vector<1x8x8xf32>
    %22 = tpu.concatenate %20, %21 in 0 : vector<1x8x8xf32>, vector<1x8x8xf32> -> vector<2x8x8xf32>
    %23 = vector.extract_strided_slice %16 {offsets = [0, 0, 0], sizes = [1, 8, 8], strides = [1, 1, 1]} : vector<1x8x16xf32> to vector<1x8x8xf32>
    %24 = vector.extract_strided_slice %16 {offsets = [0, 0, 8], sizes = [1, 8, 8], strides = [1, 1, 1]} : vector<1x8x16xf32> to vector<1x8x8xf32>
    %25 = tpu.concatenate %23, %24 in 0 : vector<1x8x8xf32>, vector<1x8x8xf32> -> vector<2x8x8xf32>
    "tpu.trace_start"() <{level = 10 : i32, message = "bqd,bkd->bqk"}> : () -> ()
    %cst_17 = arith.constant dense<0.000000e+00> : vector<2x8x8xf32>
    %26 = tpu.matmul %19, %22, %cst_17 {dimension_numbers = #tpu.dot_dimension_numbers<[2], [2], [1], [1], [0, 0, 0, 1, 1, 1], [0], [0]>} : vector<2x8x8xf32>, vector<2x8x8xf32>, vector<2x8x8xf32> -> vector<2x8x8xf32>
    "tpu.trace_stop"() : () -> ()
    %cst_18 = arith.constant dense<0xFF800000> : vector<2x8xf32>
    %27 = vector.multi_reduction <maximumf>, %26, %cst_18 [2] : vector<2x8x8xf32> to vector<2x8xf32>
    %28 = vector.shape_cast %27 : vector<2x8xf32> to vector<2x8x1xf32>
    %29 = vector.broadcast %28 : vector<2x8x1xf32> to vector<2x8x8xf32>
    %30 = arith.subf %26, %29 : vector<2x8x8xf32>
    %31 = math.exp %30 : vector<2x8x8xf32>
    %cst_19 = arith.constant dense<0.000000e+00> : vector<2x8xf32>
    %32 = vector.multi_reduction <add>, %31, %cst_19 [2] : vector<2x8x8xf32> to vector<2x8xf32>
    %33 = vector.shape_cast %32 : vector<2x8xf32> to vector<2x8x1xf32>
    %34 = vector.broadcast %33 : vector<2x8x1xf32> to vector<2x8x8xf32>
    %35 = arith.divf %31, %34 : vector<2x8x8xf32>
    "tpu.trace_start"() <{level = 10 : i32, message = "bqk,bkd->bqd"}> : () -> ()
    %cst_20 = arith.constant dense<0.000000e+00> : vector<2x8x8xf32>
    %36 = tpu.matmul %35, %25, %cst_20 {dimension_numbers = #tpu.dot_dimension_numbers<[2], [1], [1], [2], [0, 0, 0, 1, 1, 2], [0], [0]>} : vector<2x8x8xf32>, vector<2x8x8xf32>, vector<2x8x8xf32> -> vector<2x8x8xf32>
    "tpu.trace_stop"() : () -> ()
    %c0_21 = arith.constant 0 : index
    %c0_22 = arith.constant 0 : index
    %c0_23 = arith.constant 0 : index
    %37 = vector.load %arg7[%c0_21, %c0_22, %c0_23] : memref<2x8x32xf32, #tpu.memory_space<vmem>>, vector<2x8x32xf32>
    "tpu.trace_start"() <{level = 10 : i32, message = "hmd,hdn->hmn"}> : () -> ()
    %cst_24 = arith.constant dense<0.000000e+00> : vector<2x8x32xf32>
    %38 = tpu.matmul %36, %37, %cst_24 {dimension_numbers = #tpu.dot_dimension_numbers<[2], [1], [1], [2], [0, 0, 0, 1, 1, 2], [0], [0]>} : vector<2x8x8xf32>, vector<2x8x32xf32>, vector<2x8x32xf32> -> vector<2x8x32xf32>
    "tpu.trace_stop"() : () -> ()
    %cst_25 = arith.constant dense<0.000000e+00> : vector<8x32xf32>
    %39 = vector.multi_reduction <add>, %38, %cst_25 [0] : vector<2x8x32xf32> to vector<8x32xf32>
    %40 = arith.addf %39, %1 : vector<8x32xf32>
    %cst_26 = arith.constant dense<0.000000e+00> : vector<8xf32>
    %41 = vector.multi_reduction <add>, %40, %cst_26 [1] : vector<8x32xf32> to vector<8xf32>
    %42 = vector.shape_cast %41 : vector<8xf32> to vector<8x1xf32>
    %cst_27 = arith.constant 3.200000e+01 : f32
    %43 = vector.broadcast %cst_27 : f32 to vector<8x1xf32>
    %44 = arith.divf %42, %43 : vector<8x1xf32>
    %45 = vector.broadcast %44 : vector<8x1xf32> to vector<8x32xf32>
    %46 = arith.subf %40, %45 : vector<8x32xf32>
    %47 = arith.mulf %46, %46 : vector<8x32xf32>
    %cst_28 = arith.constant dense<0.000000e+00> : vector<8xf32>
    %48 = vector.multi_reduction <add>, %47, %cst_28 [1] : vector<8x32xf32> to vector<8xf32>
    %49 = vector.shape_cast %48 : vector<8xf32> to vector<8x1xf32>
    %cst_29 = arith.constant 3.200000e+01 : f32
    %50 = vector.broadcast %cst_29 : f32 to vector<8x1xf32>
    %51 = arith.divf %49, %50 : vector<8x1xf32>
    %cst_30 = arith.constant 9.99999997E-7 : f32
    %52 = vector.broadcast %cst_30 : f32 to vector<8x1xf32>
    %53 = arith.addf %51, %52 : vector<8x1xf32>
    %54 = math.rsqrt %53 : vector<8x1xf32>
    %55 = vector.broadcast %54 : vector<8x1xf32> to vector<8x32xf32>
    %56 = arith.mulf %46, %55 : vector<8x32xf32>
    %c0_31 = arith.constant 0 : index
    %c0_32 = arith.constant 0 : index
    %57 = vector.load %arg8[%c0_31, %c0_32] : memref<1x32xf32, #tpu.memory_space<vmem>>, vector<1x32xf32>
    %58 = vector.broadcast %57 : vector<1x32xf32> to vector<8x32xf32>
    %59 = arith.mulf %56, %58 : vector<8x32xf32>
    %c0_33 = arith.constant 0 : index
    %c0_34 = arith.constant 0 : index
    %60 = vector.load %arg9[%c0_33, %c0_34] : memref<1x32xf32, #tpu.memory_space<vmem>>, vector<1x32xf32>
    %61 = vector.broadcast %60 : vector<1x32xf32> to vector<8x32xf32>
    %62 = arith.addf %59, %61 : vector<8x32xf32>
    %63 = vector.shape_cast %62 : vector<8x32xf32> to vector<1x8x32xf32>
    %c0_35 = arith.constant 0 : index
    %c0_36 = arith.constant 0 : index
    %c0_37 = arith.constant 0 : index
    %64 = vector.load %arg10[%c0_35, %c0_36, %c0_37] : memref<1x8x32xf32, #tpu.memory_space<vmem>>, vector<1x8x32xf32>
    tpu.vector_store %arg10[%c0_35, %c0_36, %c0_37], %63 {strides = array<i32>} : memref<1x8x32xf32, #tpu.memory_space<vmem>>, vector<1x8x32xf32>,
    return
  }
  func.func @transform_0(%arg0: i32) -> (i32, i32, i32) {
    %c0_i32 = arith.constant 0 : i32
    %c0_i32_0 = arith.constant 0 : i32
    %c0_i32_1 = arith.constant 0 : i32
    return %arg0, %c0_i32, %c0_i32_0 : i32, i32, i32
  }
  func.func @transform_1(%arg0: i32) -> (i32, i32, i32) {
    %c0_i32 = arith.constant 0 : i32
    %c0_i32_0 = arith.constant 0 : i32
    %c0_i32_1 = arith.constant 0 : i32
    return %arg0, %c0_i32, %c0_i32_0 : i32, i32, i32
  }
  func.func @transform_2(%arg0: i32) -> (i32, i32, i32) {
    %c0_i32 = arith.constant 0 : i32
    %c0_i32_0 = arith.constant 0 : i32
    %c0_i32_1 = arith.constant 0 : i32
    return %arg0, %c0_i32, %c0_i32_0 : i32, i32, i32
  }
  func.func @transform_3(%arg0: i32) -> (i32, i32) {
    %c0_i32 = arith.constant 0 : i32
    %c0_i32_0 = arith.constant 0 : i32
    %c0_i32_1 = arith.constant 0 : i32
    return %c0_i32, %c0_i32_0 : i32, i32
  }
  func.func @transform_4(%arg0: i32) -> (i32, i32) {
    %c0_i32 = arith.constant 0 : i32
    %c0_i32_0 = arith.constant 0 : i32
    %c0_i32_1 = arith.constant 0 : i32
    return %c0_i32, %c0_i32_0 : i32, i32
  }
  func.func @transform_5(%arg0: i32) -> (i32, i32) {
    %c0_i32 = arith.constant 0 : i32
    %c0_i32_0 = arith.constant 0 : i32
    %c0_i32_1 = arith.constant 0 : i32
    return %c0_i32, %c0_i32_0 : i32, i32
  }
  func.func @transform_6(%arg0: i32) -> (i32, i32, i32) {
    %c0_i32 = arith.constant 0 : i32
    %c0_i32_0 = arith.constant 0 : i32
    %c0_i32_1 = arith.constant 0 : i32
    %c0_i32_2 = arith.constant 0 : i32
    return %c0_i32, %c0_i32_0, %c0_i32_1 : i32, i32, i32
  }
  func.func @transform_7(%arg0: i32) -> (i32, i32) {
    %c0_i32 = arith.constant 0 : i32
    %c0_i32_0 = arith.constant 0 : i32
    %c0_i32_1 = arith.constant 0 : i32
    return %c0_i32, %c0_i32_0 : i32, i32
  }
  func.func @transform_8(%arg0: i32) -> (i32, i32) {
    %c0_i32 = arith.constant 0 : i32
    %c0_i32_0 = arith.constant 0 : i32
    %c0_i32_1 = arith.constant 0 : i32
    return %c0_i32, %c0_i32_0 : i32, i32
  }
  func.func @transform_9(%arg0: i32) -> (i32, i32, i32) {
    %c0_i32 = arith.constant 0 : i32
    %c0_i32_0 = arith.constant 0 : i32
    %c0_i32_1 = arith.constant 0 : i32
    return %arg0, %c0_i32, %c0_i32_0 : i32, i32, i32
  }
}

</mosaic_0001>

<bundles_post_ra>
// kernel: tpu_custom_call.1
= control target key start
LH: loop header
LB: loop body
LE: loop exit
PB: predicated region body
PF: predicated region fallthrough
CT: control target
= control target key end

     0   :  { %s1697_s0 = inlined_call_operand.vmem [shape: f32[2,8,32], index: 0, kind: input, shape index: {}]   ;;  %s1698_s1 = inlined_call_operand.vmem [shape: f32[2,8,32], index: 1, kind: input, shape index: {}]   ;;  %s1699_s2 = inlined_call_operand.vmem [shape: f32[2,8,32], index: 2, kind: input, shape index: {}]   ;;  %s1700_s3 = inlined_call_operand.vmem [shape: f32[32,16], index: 3, kind: input, shape index: {}]   ;;  %s1701_s4 = inlined_call_operand.vmem [shape: f32[32,16], index: 4, kind: input, shape index: {}]   ;;  %s1702_s5 = inlined_call_operand.vmem [shape: f32[32,16], index: 5, kind: input, shape index: {}]   ;;  %s1703_s6 = inlined_call_operand.vmem [shape: f32[2,8,32], index: 6, kind: input, shape index: {}]   ;;  %s1704_s7 = inlined_call_operand.vmem [shape: f32[1,32], index: 7, kind: input, shape index: {}]   ;;  %s1705_s8 = inlined_call_operand.vmem [shape: f32[1,32], index: 8, kind: input, shape index: {}]   ;;  %s1706_s9 = inlined_call_operand.hbm [shape: f32[2,8,32], index: 9, kind: output, shape index: {}]  }
   0x1   :  { %1707 = sst [smem:[#allocation5_spill]] %s1697_s0 }
   0x2   :  { %14 = vsyncpa [#allocation3], 0 }
   0x3   :  { %16 = vsyncpa [#allocation3 + $0x1], 0  ;;  %s1488_s30 = smov 0   ;;  %s1490_s10 = smov 0  }
   0x4   :  { %s1492_s11 = smov 0   ;;  %s1494_s12 = smov 0  }
   0x5 LB: > { %s1509_s13 = sadd.s32 4294967295, %s1432_s12   ;;  %s1205_s14 = sadd.s32 4294967294, %s1432_s12   ;;  %s1432_s12 = sphi %s1494_s12, %s1714_s12   ;;  %s1428_s11 = sphi %s1492_s11, %s1713_s11   ;;  %s1424_s10 = sphi %s1490_s10, %s1712_s10   ;;  %s1420_s30 = sphi %s1488_s30, %s1711_s30  }
   0x6   : > { %s1513_s15 = sadd.s32 1, %s1432_s12   ;;  %s233_s16 = sadd.s32 1, %s1428_s11 }
   0x7   : > { %s230_s17 = ssub.s32 %s1432_s12, %s1513_s15  ;;  %p243_p0 = scmp.ne.s32.totalorder %s1428_s11, %s1424_s10 }
   0x8   : > { %p231_p1 = scmp.eq.s32.totalorder %s230_s17, 0  ;;  %p244_p2 = scmp.eq.s32.totalorder %s1509_s13, 1 }
   0x9   : > { %p249_p3 = scmp.ne.s32.totalorder %s1424_s10, %s1420_s30  ;;  %p250_p4 = scmp.eq.s32.totalorder %s1205_s14, 1 }
   0xa   : > { %s1524_s18 = scalar_select %p231_p1, %s1428_s11, %s233_s16  }
   0xb   : > { %p1526_p5 = por %p244_p2, %p243_p0  ;;  %p1530_p6 = por %p250_p4, %p249_p3 }
   0xc   : > { %p1208_p7 = scmp.ge.s32.totalorder %s1432_s12, 1  ;;  %p307_p8 = scmp.lt.s32.totalorder %s1432_s12, 3 }
   0xe   : > { %p308_p9 = pnand %p1208_p7, %p307_p8 }
   0xf   : > { %p350_p10 = scmp.lt.s32.totalorder (!%p308_p9), %s1509_s13, 1  ;;  %s1710_s0 = sld [smem:[#allocation5_spill]] (!%p308_p9) }
  0x10   : > { %311 = sbr.rel (%p308_p9) target bundleno = 1559 (0x617), region = 56  ;;  %s1436_s21 = smov (!%p308_p9), 120  }
  0x11   : > { %s347_s26 = sand.u32 (!%p308_p9), 1, %s1424_s10   ;;  %s1227_s17 = sshll.u32 (!%p308_p9), %s1509_s13, 7 }
  0x12   : > { %s1120_s25 = scalar_lea.hbm (!%p308_p9), %s1706_s9, %s1227_s17  ;;  %s1437_s14 = smov (!%p308_p9), [#allocation2]  }
  0x15   : > { %v447_v0 = vld [vmem:[%s1701_s4 + $0x18] sm:$0xff]  ;;  %v1434_v2 = vmov 0.0   ;;  %v446_v3 = vld [vmem:[%s1701_s4 + $0x10] sm:$0xff]  ;;  %s351_s29 = scalar_select %p350_p10, %s1509_s13, 1  ;;  %v445_v5 = vld [vmem:[%s1701_s4 + $0x8] sm:$0xff]  ;;  %vm370_vm0 = vcmask 261120  }
  0x16   : > { %v369_v1 = vld [vmem:[%s1700_s3 + $0x18] sm:$0xff]  ;;  %1268 = vmatprep.subr.mxu1 %v1434_v2  ;;  %1257 = vmatprep.subr.mxu0 %v1434_v2  ;;  %v368_v4 = vld [vmem:[%s1700_s3 + $0x10] sm:$0xff]  ;;  %v367_v6 = vld [vmem:[%s1700_s3 + $0x8] sm:$0xff]  ;;  %vm1435_vm1 = vmmov 0   ;;  %vm608_vm2 = vcmask 64512  }
  0x17   : > { %1269 = vmatpush3.msra.mxu1 %v447_v0  ;;  %1258 = vmatpush3.msra.mxu0 %v369_v1  ;;  %s1560_s22 = sshll.u32 %s351_s29, 3  ;;  %v444_v7 = vld [vmem:[%s1701_s4] sm:$0xff]  ;;  %v524_v16 = vld [vmem:[%s1702_s5 + $0x18] sm:$0xff]  ;;  %v523_v17 = vld [vmem:[%s1702_s5 + $0x10] sm:$0xff] }
  0x18   : > { %1270 = vmatprep.subr.mxu1 %v1434_v2  ;;  %1259 = vmatprep.subr.mxu0 %v1434_v2  ;;  %s353_s27 = scalar_lea.vmem %s1710_s0, %s1560_s22  ;;  %s357_s16 = scalar_lea.vmem %s1698_s1, %s1560_s22  ;;  %v366_v9 = vld [vmem:[%s1700_s3] sm:$0xff]  ;;  %v522_v18 = vld [vmem:[%s1702_s5 + $0x8] sm:$0xff] }
  0x19   : > { %1271 = vmatpush3.msra.mxu1 %v446_v3  ;;  %1260 = vmatpush3.msra.mxu0 %v368_v4  ;;  %v363_v8 = vld [vmem:[%s357_s16] sm:$0xff]  ;;  %s361_s29 = scalar_lea.vmem %s1699_s2, %s1560_s22  ;;  %v926_v49 = vld [vmem:[%s1703_s6 + $0x8] sm:$0xff]  ;;  %s1109_s0 = scalar_lea.sflag [#allocation3], %s347_s26 }
  0x1a   : > { %1272 = vmatprep.subr.mxu1 %v1434_v2  ;;  %1261 = vmatprep.subr.mxu0 %v1434_v2  ;;  %v1578_v10 = vld [vmem:[%s353_s27] sm:$0xff]  ;;  %s1209_s27 = sshll.u32 %s347_s26, 3  ;;  %s1376_s16 = sshll.u32 %s1437_s14, 4  ;;  %s1377_s16 = int_to_ptr.vmem [resolvable:$false] %s1376_s16 }
  0x1b   : > { %1273 = vmatpush3.msra.mxu1 %v445_v5  ;;  %1262 = vmatpush3.msra.mxu0 %v367_v6  ;;  %v365_v11 = vmul.f32 0.35355338, %v1578_v10  ;;  %v521_v19 = vld [vmem:[%s1702_s5] sm:$0xff]  ;;  %s349_s23 = scalar_lea.vmem [#allocation2], %s1209_s27  ;;  %s1378_s13 = scalar_lea.vmem %s1377_s16, 256 }
  0x1c   : > { %1274 = vmatprep.subr.mxu1 %v1434_v2  ;;  %1276 = vmatprep.mubr.msk.f32.mxu1 %vm1435_vm1, %v1434_v2  ;;  %v364_v20 = vld [vmem:[%s361_s29] sm:$0xff]  ;;  %s1122_s22 = sshll.u32 %s349_s23, 4  ;;  %s1123_s22 = int_to_ptr.vmem [resolvable:$true] %s1122_s22 }
  0x1d   : > { %1275 = vmatpush3.msra.mxu1 %v444_v7  ;;  %1263 = vmatprep.subr.mxu0 %v1434_v2  ;;  %v925_v44 = vld [vmem:[%s1703_s6] sm:$0xff]  ;;  %s1372_s28 = scalar_lea.vmem %s1123_s22, 128  ;;  %p1379_p0 = scmp.lt.s32.totalorder %s1123_s22, %s1377_s16 }
  0x1e   : > { %1277 = vmatmul.mubr.msk.f32.vlgmr.msra.gmra.mxu1 %vm370_vm0, %v363_v8  ;;  %1264 = vmatpush3.msra.mxu0 %v366_v9  ;;  %v1224_v8 = vld [vmem:[%s1704_s7] ss:$0 sm:$0xff]  ;;  %p1373_p11 = scmp.ne.s32.totalorder %s1123_s22, %s1372_s28  ;;  %p1380_p1 = scmp.lt.s32.totalorder %s1378_s13, %s1372_s28 }
  0x1f   : > { %1265 = vmatprep.mubr.msk.f32.mxu0 %vm1435_vm1, %v1434_v2  ;;  %1290 = vmatprep.subr.mxu1 %v1434_v2 }
  0x20   : > { %1266 = vmatmul.mubr.msk.f32.vlgmr.msra.gmra.mxu0 %vm370_vm0, %v365_v11  ;;  %1292 = vmatprep.mubr.msk.f32.mxu1 %vm1435_vm1, %v1434_v2  ;;  %p1374_p12 = pnand %p1373_p11, %p1526_p5  ;;  %p1381_p2 = por %p1380_p1, %p1379_p0 }
  0x21   : > { %1279 = vmatprep.subr.mxu0 %v1434_v2  ;;  %1287 = vmatprep.mubr.msk.f32.mxu0 %vm1435_vm1, %v1434_v2 }
  0x22   : > { %1280 = vmatpush3.msra.mxu0 %v524_v16  ;;  %p1375_p13 = pneg %p1374_p12 }
  0x23   : > { %1281 = vmatprep.subr.mxu0 %v1434_v2 }
  0x24   : > { %1282 = vmatpush3.msra.mxu0 %v523_v17  ;;  %p1382_p3 = pnand %p1381_p2, %p1375_p13 }
  0x25   : > { %1283 = vmatprep.subr.mxu0 %v1434_v2 }
  0x26   : > { %1284 = vmatpush3.msra.mxu0 %v522_v18 }
  0x27   : > { %1285 = vmatprep.subr.mxu0 %v1434_v2 }
  0x28   : > { %1286 = vmatpush3.msra.mxu0 %v521_v19 }
  0x29   : > { %1288 = vmatmul.mubr.msk.f32.vlgmr.msra.gmra.mxu0 %vm370_vm0, %v364_v20  ;;  %1300 = vmatprep.subr.mxu0 %v1434_v2 }
  0x2a   : > { %1302 = vmatprep.mubr.msk.f32.mxu0 %vm1435_vm1, %v1434_v2 }
  0xde   : > { %v517_v12 = vpop.f32.mrf.mxu1 }
  0xdf   : > { %602 = vrot.lane.b32.xlu0 %v517_v12, %s1436_s21  ;;  %1291 = vmatpush3.xpose.msk.msra.mxu1 %vm608_vm2, %v517_v12 }
  0xe0   : > { %v440_v13 = vpop.f32.mrf.mxu0  ;;  %v1278_v14 = vpop.f32.mrf.mxu1  ;;  %1295 = vmatprep.subr.mxu1 %v1434_v2 }
  0xe2   : > { %v1267_v15 = vpop.f32.mrf.mxu0  ;;  %1293 = vmatmul.mubr.msk.f32.vlgmr.msra.gmra.mxu1 %vm608_vm2, %v440_v13 }
  0xe3   : > { %599 = vrot.lane.b32.xlu0 %v440_v13, %s1436_s21  ;;  %1297 = vmatprep.mubr.msk.f32.mxu1 %vm1435_vm1, %v1434_v2 }
  0xe9   : > { %v594_v34 = vpop.f32.mrf.mxu0 }
  0xea   : > { %1301 = vmatpush3.msra.mxu0 %v594_v34 }
  0xeb   : > { %v1289_v35 = vpop.f32.mrf.mxu0  ;;  %1310 = vmatprep.subr.mxu0 %v1434_v2 }
 0x151   : > { %v603_v21 = vpop.permute.xlu0 %602 }
 0x152   : > { %1296 = vmatpush3.xpose.msk.msra.mxu1 %vm608_vm2, %v603_v21 }
 0x153   : > { %1305 = vmatprep.subr.mxu1 %v1434_v2 }
 0x155   : > { %v600_v22 = vpop.permute.xlu0 %599 }
 0x156   : > { %1298 = vmatmul.mubr.msk.f32.vlgmr.msra.gmra.mxu1 %vm608_vm2, %v600_v22 }
 0x157   : > { %1307 = vmatprep.mubr.msk.f32.mxu1 %vm1435_vm1, %v1434_v2 }
 0x1a2   : > { %v679_v23 = vpop.f32.mrf.mxu1 }
 0x1a3   : > { %v757_v24 = vsel %vm608_vm2, %v679_v23, -inf }
 0x1a4   : > { %758 = vmax.xlane.f32.xlu1 %v757_v24  ;;  %v1294_v25 = vpop.f32.mrf.mxu1 }
 0x216   : > { %v753_v26 = vpop.f32.mrf.mxu1 }
 0x217   : > { %v760_v27 = vsel %vm608_vm2, %v753_v26, -inf }
 0x218   : > { %761 = vmax.xlane.f32.xlu1 %v760_v27  ;;  %v1299_v28 = vpop.f32.mrf.mxu1 }
 0x22d   : > { %v759_v29 = vpop.xlane.xlu1 %758 }
 0x22e   : > { %v763_v30 = vsub.f32 %v679_v23, %v759_v29 }
 0x230   : > { %v765_v31 = vmul.f32 1.442695, %v763_v30 }
 0x232   : > { %1362 = vpow2.f32 %v765_v31 }
 0x23f   : > { %v1363_v32 = vpop.eup %1362 }
 0x240   : > { %v769_v33 = vsel %vm608_vm2, %v1363_v32, 0.0 }
 0x241   : > { %770 = vadd.xlane.f32.xlu0 %v769_v33 }
 0x2a1   : > { %v762_v36 = vpop.xlane.xlu1 %761 }
 0x2a2   : > { %v764_v37 = vsub.f32 %v753_v26, %v762_v36 }
 0x2a4   : > { %v767_v38 = vmul.f32 1.442695, %v764_v37 }
 0x2a6   : > { %1364 = vpow2.f32 %v767_v38 }
 0x2b3   : > { %v1365_v39 = vpop.eup %1364 }
 0x2b4   : > { %v772_v40 = vsel %vm608_vm2, %v1365_v39, 0.0 }
 0x2b5   : > { %773 = vadd.xlane.f32.xlu1 %v772_v40 }
 0x2c6   : > { %605 = vrot.lane.b32.xlu1 %v594_v34, %s1436_s21 }
 0x2ca   : > { %v771_v41 = vpop.xlane.xlu0 %770 }
 0x2cb   : > { %1366 = vrcp.f32 %v771_v41 }
 0x2d8   : > { %v1367_v42 = vpop.eup %1366 }
 0x2d9   : > { %v776_v43 = vmul.f32 %v1367_v42, %v1363_v32 }
 0x2db   : > { %1303 = vmatmul.mubr.msk.f32.vlgmr.msra.gmra.mxu0 %vm608_vm2, %v776_v43 }
 0x2dc   : > { %1312 = vmatprep.mubr.msk.f32.mxu0 %vm1435_vm1, %v1434_v2  ;;  %1311 = vmatpush3.msra.mxu0 %v925_v44 }
 0x33e   : > { %v774_v45 = vpop.xlane.xlu1 %773 }
 0x33f   : > { %1368 = vrcp.f32 %v774_v45 }
 0x342   : > { %v606_v46 = vpop.permute.xlu1 %605 }
 0x343   : > { %1306 = vmatpush3.msra.mxu1 %v606_v46 }
 0x344   : > { %1315 = vmatprep.subr.mxu1 %v1434_v2 }
 0x34c   : > { %v1369_v47 = vpop.eup %1368 }
 0x34d   : > { %v778_v48 = vmul.f32 %v1369_v47, %v1365_v39 }
 0x34f   : > { %1308 = vmatmul.mubr.msk.f32.vlgmr.msra.gmra.mxu1 %vm608_vm2, %v778_v48 }
 0x350   : > { %1316 = vmatpush3.msra.mxu1 %v926_v49  ;;  %1317 = vmatprep.mubr.msk.f32.mxu1 %vm1435_vm1, %v1434_v2 }
 0x39b   : > { %v848_v50 = vpop.f32.mrf.mxu0 }
 0x39c   : > { %1313 = vmatmul.mubr.msk.f32.vlgmr.msra.gmra.mxu0 %vm608_vm2, %v848_v50 }
 0x39d   : > { %v1304_v51 = vpop.f32.mrf.mxu0 }
 0x40f   : > { %v921_v52 = vpop.f32.mrf.mxu1 }
 0x410   : > { %1318 = vmatmul.mubr.msk.f32.vlgmr.msra.gmra.mxu1 %vm608_vm2, %v921_v52 }
 0x411   : > { %v1309_v53 = vpop.f32.mrf.mxu1 }
 0x45c   : > { %v996_v54 = vpop.f32.mrf.mxu0 }
 0x45d   : > { %v1073_v57 = vsel %vm370_vm0, %v996_v54, 0.0 }
 0x45e   : > { %v1314_v55 = vpop.f32.mrf.mxu0 }
 0x4d0   : > { %v1069_v56 = vpop.f32.mrf.mxu1 }
 0x4d1   : > { %v1074_v58 = vsel %vm370_vm0, %v1069_v56, 0.0 }
 0x4d2   : > { %v1075_v59 = vadd.f32 %v1074_v58, %v1073_v57  ;;  %v1319_v60 = vpop.f32.mrf.mxu1 }
 0x4d4   : > { %v1076_v61 = vadd.f32 %v1075_v59, %v1578_v10  ;;  %v1225_v10 = vld [vmem:[%s1705_s8] ss:$0 sm:$0xff] }
 0x4d6   : > { %v1077_v62 = vsel %vm370_vm0, %v1076_v61, 0.0 }
 0x4d7   : > { %1078 = vadd.xlane.f32.xlu1 %v1077_v62 }
 0x560   : > { %v1079_v63 = vpop.xlane.xlu1 %1078 }
 0x561   : > { %v1081_v0 = vmul.f32 0.03125, %v1079_v63 }
 0x563   : > { %v1082_v1 = vsub.f32 %v1076_v61, %v1081_v0 }
 0x565   : > { %v1083_v2 = vmul.f32 %v1082_v1, %v1082_v1 }
 0x567   : > { %v1084_v3 = vsel %vm370_vm0, %v1083_v2, 0.0 }
 0x568   : > { %1085 = vadd.xlane.f32.xlu0 %v1084_v3 }
 0x5f1   : > { %v1086_v4 = vpop.xlane.xlu0 %1085 }
 0x5f2   : > { %v1087_v5 = vmul.f32 0.03125, %v1086_v4 }
 0x5f4   : > { %v1088_v6 = vadd.f32 1e-06, %v1087_v5 }
 0x5f6   : > { %1370 = vrsqrt.f32 %v1088_v6 }
 0x603   : > { %v1371_v7 = vpop.eup %1370 }
 0x604   : > { %v1090_v9 = vmul.f32 %v1371_v7, %v1082_v1 }
 0x606   : > { %v1098_v11 = vmul.f32 %v1224_v8, %v1090_v9 }
 0x608   : > { %v1106_v12 = vadd.f32 %v1225_v10, %v1098_v11 }
 0x60a   : > { %1107 = vst.msk [vmem:[%s349_s23] sm:$0xff] %vm370_vm0, %v1106_v12 }
 0x60b   : > { %1385 = shalt.err (!%p1382_p3)
}
 0x60c   : > { %s1386_s27 = scalar_lea.hbm %s1120_s25, 128  ;;  %s1390_s17 = scalar_lea.hbm %s1706_s9, 256 }
 0x60d   : > { %p1387_p4 = scmp.ne.s32.totalorder %s1120_s25, %s1386_s27  ;;  %p1391_p9 = scmp.lt.s32.totalorder %s1120_s25, %s1706_s9 }
 0x60e   : > { %p1392_p10 = scmp.lt.s32.totalorder %s1390_s17, %s1386_s27 }
 0x60f   : > { %p1388_p7 = pnand %p1387_p4, %p1526_p5 }
 0x610   : > { %p1393_p11 = por %p1392_p10, %p1391_p9 }
 0x611   : > { %p1389_p8 = pneg %p1388_p7 }
 0x613   : > { %p1394_p12 = pnand %p1393_p11, %p1389_p8 }
 0x615   : > { %1397 = shalt.err (!%p1394_p12)
}
 0x616   : > { %1320 = dma.vmem_to_hbm [thread:$0]  (%p1526_p5), %s1123_s22, 128, %s1120_s25, %s1109_s0  }
 0x617 PF: > { %p1326_p13 = scmp.ge.s32.totalorder %s1432_s12, 2  ;;  %s1134_s21 = sand.u32 1, %s1420_s30  }
 0x618   : > { %s1135_s28 = scalar_lea.sflag [#allocation3], %s1134_s21 }
 0x619   : > { %p1323_p0 = pnand %p1326_p13, %p1530_p6 }
 0x61b   : > { %p1324_p1 = pneg %p1323_p0 }
 0x61d   : > { %1415 = dma.done.wait (%p1324_p1), %s1135_s28, 128  }
 0x61e   : > { %1417 = vsyncadd (%p1324_p1), %s1135_s28, 4294967168  ;;  %p19_p2 = scmp.ge.s32.totalorder %s1513_s15, 4   ;;  %s1711_s30 = smov %s1424_s10 }
 0x61f   : > { %s1712_s10 = smov %s1428_s11  ;;  %s1713_s11 = smov %s1524_s18 }
 0x620   : > { %s1714_s12 = smov %s1513_s15  ;;  %21 = sbr.rel (!%p19_p2) target bundleno = 5 (0x5), region = 97 }
 0x625   :  { %1140 = vsyncpa [#allocation3], 1 }
 0x626   :  { %1142 = vsyncpa [#allocation3 + $0x1], 1 }

</bundles_post_ra>
